<compile_context>
chip_gen: v7x
topology: tpu7x:2x2x1
jax: 0.10.0
libtpu: 0.0.40
codegen_flags: <defaults>
</compile_context>

<pallas_src>
import functools
import math

import jax
import jax.numpy as jnp
from jax.experimental import pallas as pl
from jax.experimental.pallas import tpu as pltpu


def _cdiv(a: int, b: int) -> int:
    return -(-a // b)


def _round_up(x: int, m: int) -> int:
    return _cdiv(x, m) * m


def _pick_batch_tiling(B: int, max_tb: int = 256):
    """Batch tile size / count: >=2 'parallel' tiles when B allows (v7x
    megacore), tile a multiple of 8 (f32 sublane), waste bounded (~<=7 rows)."""
    n_tiles = max(1, _cdiv(B, max_tb))
    if n_tiles == 1 and B >= 16:
        n_tiles = 2                       # feed both TensorCores on v7x
    if n_tiles == 1:
        return B, 1                       # single block == full batch dim (always legal)
    tb = _round_up(_cdiv(B, n_tiles), 8)
    n_tiles = _cdiv(B, tb)
    return tb, n_tiles


def _svdd_resident_kernel(x_ref, w_ref, c_ref, out_ref, *, apply_estimate,
                          compute_dtype):
    # x_ref: (TB, K) f32  w_ref: (K, Dp) f32 (resident)  c_ref: (1, Dp) f32
    # out_ref: (1, 1, TB) f32 — lane-dense scores for this batch tile.
    x = x_ref[...]
    w = w_ref[...]
    if jnp.dtype(compute_dtype) != jnp.dtype(jnp.float32):
        x = x.astype(compute_dtype)       # in-kernel cast: VPU, free (mem-bound)
        w = w.astype(compute_dtype)
    z = jnp.dot(x, w, preferred_element_type=jnp.float32)        # (TB, Dp) MXU
    diff = z - c_ref[...]
    val = jnp.sqrt(jnp.sum(diff * diff, axis=1))                  # (TB,)
    if apply_estimate:
        val = 1.0 - jnp.exp(-val)                                 # fused estimate()
    out_ref[...] = val[None, None, :]                             # lane-dense store


def _svdd_tiled_kernel(x_ref, w_ref, c_ref, out_ref, acc_ref, *, apply_estimate,
                       compute_dtype, k_total, tk, mask_tail):
    # Fallback for very wide encoders: K tiled on the last ("arbitrary") axis,
    # f32 accumulator in VMEM scratch, epilogue at the last K step.
    k = pl.program_id(1)

    @pl.when(k == 0)
    def _():
        acc_ref[...] = jnp.zeros_like(acc_ref)

    x = x_ref[...]
    if mask_tail:
        # K % TK != 0: the last x block reads past the array edge; zero those
        # columns (W is zero-padded along K, so the product is exactly 0).
        col = jax.lax.broadcasted_iota(jnp.int32, x.shape, 1) + k * tk
        x = jnp.where(col < k_total, x, 0.0)
    w = w_ref[...]
    if jnp.dtype(compute_dtype) != jnp.dtype(jnp.float32):
        x = x.astype(compute_dtype)
        w = w.astype(compute_dtype)
    acc_ref[...] += jnp.dot(x, w, preferred_element_type=jnp.float32)

    @pl.when(k == pl.num_programs(1) - 1)
    def _():
        diff = acc_ref[...] - c_ref[...]
        val = jnp.sqrt(jnp.sum(diff * diff, axis=1))
        if apply_estimate:
            val = 1.0 - jnp.exp(-val)
        out_ref[...] = val[None, None, :]


def _deepsvdd_scores(x_nchw, w, c, *, apply_estimate,
                     compute_dtype=jnp.float32, k_tile=None):
    """x_nchw: (B, C, H, W); w: (K, D); c: (D,) -> (B,) f32 anomaly scores."""
    B = x_nchw.shape[0]
    K = math.prod(x_nchw.shape[1:])
    K_w, D = w.shape
    assert K_w == K, (K_w, K)
    assert c.shape[-1] == D, (c.shape, D)

    Dp = _round_up(D, 128)                # zero columns contribute 0 to the norm
    TB, n_b = _pick_batch_tiling(B)

    x2 = x_nchw.reshape(B, K)             # stays f32 — no cast, no pad of x
    w_p = w.astype(jnp.float32)
    c_p = jnp.reshape(c, (1, D)).astype(jnp.float32)
    if Dp != D:
        w_p = jnp.pad(w_p, ((0, 0), (0, Dp - D)))
        c_p = jnp.pad(c_p, ((0, 0), (0, Dp - D)))

    # W-resident path when the double-buffered x tile + resident W fit easily.
    resident_bytes = 4 * (2 * TB * K + 2 * K * Dp + 2 * Dp + 2 * TB)
    use_resident = (k_tile is None) and (resident_bytes <= 28 * 1024 * 1024)

    if use_resident:
        grid = (n_b,)
        kernel = functools.partial(_svdd_resident_kernel,
                                   apply_estimate=apply_estimate,
                                   compute_dtype=compute_dtype)
        in_specs = [
            pl.BlockSpec((TB, K), lambda i: (i, 0)),     # x: streamed once
            pl.BlockSpec((K, Dp), lambda i: (0, 0)),     # W: constant index -> resident
            pl.BlockSpec((1, Dp), lambda i: (0, 0)),     # center: resident
        ]
        out_specs = pl.BlockSpec((1, 1, TB), lambda i: (i, 0, 0))
        scratch = []
        dim_sem = ("parallel",)
    else:
        TK = k_tile if k_tile is not None else min(2048, _round_up(K, 128))
        TK = _round_up(TK, 128)
        # Keep one W tile <= ~8 MiB so double-buffered W stays small.
        tk_cap = max(128, (((8 * 1024 * 1024) // (Dp * 4)) // 128) * 128)
        TK = max(128, min(TK, tk_cap))
        n_k = _cdiv(K, TK)
        Kp = n_k * TK
        if Kp != K:                                       # pad only W (tiny), never x
            w_p = jnp.pad(w_p, ((0, Kp - K), (0, 0)))
        grid = (n_b, n_k)
        kernel = functools.partial(_svdd_tiled_kernel,
                                   apply_estimate=apply_estimate,
                                   compute_dtype=compute_dtype,
                                   k_total=K, tk=TK, mask_tail=(Kp != K))
        in_specs = [
            pl.BlockSpec((TB, TK), lambda i, k: (i, k)),
            pl.BlockSpec((TK, Dp), lambda i, k: (k, 0)),
            pl.BlockSpec((1, Dp), lambda i, k: (0, 0)),
        ]
        out_specs = pl.BlockSpec((1, 1, TB), lambda i, k: (i, 0, 0))
        scratch = [pltpu.VMEM((TB, Dp), jnp.float32)]
        dim_sem = ("parallel", "arbitrary")

    out = pl.pallas_call(
        kernel,
        out_shape=jax.ShapeDtypeStruct((n_b, 1, TB), jnp.float32),
        grid_spec=pltpu.PrefetchScalarGridSpec(
            num_scalar_prefetch=0,
            grid=grid,
            in_specs=in_specs,
            out_specs=out_specs,
            scratch_shapes=scratch,
        ),
        compiler_params=pltpu.CompilerParams(
            dimension_semantics=dim_sem,
            vmem_limit_bytes=40 * 1024 * 1024,
        ),
    )(x2, w_p, c_p)

    return out.reshape(n_b * TB)[:B]      # (B,) — matches torch.norm(z - c, dim=1)


@jax.jit
def deepsvdd_forward(x_nchw, w, c):
    return _deepsvdd_scores(x_nchw, w, c, apply_estimate=False)


@jax.jit
def deepsvdd_estimate(x_nchw, w, c):
    # estimate(x) = 1 - exp(-forward(x)), fused into the kernel epilogue.
    return _deepsvdd_scores(x_nchw, w, c, apply_estimate=True)


if __name__ == "__main__":
    # Small shapes: B=2, C=4, H=W=16 -> K = 1024, latent D = 32.
    B, C, H, W = 2, 4, 16, 16
    K = C * H * W
    D = 32

    key = jax.random.PRNGKey(0)
    kx, kw, kc = jax.random.split(key, 3)

    x = jax.random.normal(kx, (B, C, H, W), dtype=jnp.float32)
    # Deterministic encoder weight (synthetic, not a checkpoint load).
    w_enc = jax.random.normal(kw, (K, D), dtype=jnp.float32) * 0.02
    # Deterministic hypersphere center c (set via set_center in the original).
    center = jax.random.normal(kc, (D,), dtype=jnp.float32) * 0.1

    scores = jax.block_until_ready(deepsvdd_forward(x, w_enc, center))
    est = jax.block_until_ready(deepsvdd_estimate(x, w_enc, center))

    # Also exercise the K-tiled fallback path (with tail masking, since
    # 1024 % 384 != 0) to keep it validated.
    scores_tiled = jax.block_until_ready(
        _deepsvdd_scores(x, w_enc, center, apply_estimate=False, k_tile=384))

    # Pure-JAX f32 reference (kernel computes in f32 by default).
    z_ref = jnp.dot(x.reshape(B, K), w_enc, precision=jax.lax.Precision.HIGHEST)
    ref = jnp.linalg.norm(z_ref - center[None, :], axis=1)
    est_ref = 1.0 - jnp.exp(-ref)

    assert scores.shape == (B,)
    assert est.shape == (B,)
    assert scores_tiled.shape == (B,)
    assert jnp.allclose(scores, ref, rtol=1e-2, atol=1e-2), (scores, ref)
    assert jnp.allclose(scores_tiled, ref, rtol=1e-2, atol=1e-2), (scores_tiled, ref)
    assert jnp.allclose(est, est_ref, rtol=1e-2, atol=1e-2), (est, est_ref)

    print("KERNEL_OK")
</pallas_src>

<mosaic_0001>
module attributes {stable_mosaic.version = 11 : i64} {
  func.func @_svdd_resident_kernel(%arg0: i32, %arg1: memref<2x1024xf32, #tpu.memory_space<vmem>>, %arg2: memref<1024x128xf32, #tpu.memory_space<vmem>>, %arg3: memref<1x128xf32, #tpu.memory_space<vmem>>, %arg4: memref<1x1x2xf32, #tpu.memory_space<vmem>>) attributes {dimension_semantics = [#tpu.dimension_semantics<parallel>], iteration_bounds = array<i64: 1>, scalar_prefetch = 0 : i64, scratch_operands = 0 : i64, tpu.core_type = #tpu.core_type<tc>, window_params = [{transform_indices = @transform_0, window_bounds = array<i64: 2, 1024>}, {pipeline_mode = #tpu.pipeline_mode<synchronous>, transform_indices = @transform_1, window_bounds = array<i64: 1024, 128>}, {pipeline_mode = #tpu.pipeline_mode<synchronous>, transform_indices = @transform_2, window_bounds = array<i64: 1, 128>}, {transform_indices = @transform_3, window_bounds = array<i64: 1, 1, 2>}]} {
    %c0 = arith.constant 0 : index
    %c0_0 = arith.constant 0 : index
    %0 = vector.load %arg1[%c0, %c0_0] : memref<2x1024xf32, #tpu.memory_space<vmem>>, vector<2x1024xf32>
    %c0_1 = arith.constant 0 : index
    %c0_2 = arith.constant 0 : index
    %1 = vector.load %arg2[%c0_1, %c0_2] : memref<1024x128xf32, #tpu.memory_space<vmem>>, vector<1024x128xf32>
    %cst = arith.constant dense<0.000000e+00> : vector<2x128xf32>
    %2 = tpu.matmul %0, %1, %cst {dimension_numbers = #tpu.dot_dimension_numbers<[1], [0], [0], [1], [0, 0, 1, 1], [], []>} : vector<2x1024xf32>, vector<1024x128xf32>, vector<2x128xf32> -> vector<2x128xf32>
    %c0_3 = arith.constant 0 : index
    %c0_4 = arith.constant 0 : index
    %3 = vector.load %arg3[%c0_3, %c0_4] : memref<1x128xf32, #tpu.memory_space<vmem>>, vector<1x128xf32>
    %4 = vector.broadcast %3 : vector<1x128xf32> to vector<2x128xf32>
    %5 = arith.subf %2, %4 : vector<2x128xf32>
    %6 = arith.mulf %5, %5 : vector<2x128xf32>
    %cst_5 = arith.constant dense<0.000000e+00> : vector<2xf32>
    %7 = vector.multi_reduction <add>, %6, %cst_5 [1] : vector<2x128xf32> to vector<2xf32>
    %8 = math.sqrt %7 : vector<2xf32>
    %9 = vector.shape_cast %8 : vector<2xf32> to vector<1x1x2xf32>
    %c0_6 = arith.constant 0 : index
    %c0_7 = arith.constant 0 : index
    %c0_8 = arith.constant 0 : index
    %10 = vector.load %arg4[%c0_6, %c0_7, %c0_8] : memref<1x1x2xf32, #tpu.memory_space<vmem>>, vector<1x1x2xf32>
    tpu.vector_store %arg4[%c0_6, %c0_7, %c0_8], %9 {strides = array<i32>} : memref<1x1x2xf32, #tpu.memory_space<vmem>>, vector<1x1x2xf32>,
    return
  }
  func.func @transform_0(%arg0: i32) -> (i32, i32) {
    %c0_i32 = arith.constant 0 : i32
    %c0_i32_0 = arith.constant 0 : i32
    return %arg0, %c0_i32 : i32, i32
  }
  func.func @transform_1(%arg0: i32) -> (i32, i32) {
    %c0_i32 = arith.constant 0 : i32
    %c0_i32_0 = arith.constant 0 : i32
    %c0_i32_1 = arith.constant 0 : i32
    return %c0_i32, %c0_i32_0 : i32, i32
  }
  func.func @transform_2(%arg0: i32) -> (i32, i32) {
    %c0_i32 = arith.constant 0 : i32
    %c0_i32_0 = arith.constant 0 : i32
    %c0_i32_1 = arith.constant 0 : i32
    return %c0_i32, %c0_i32_0 : i32, i32
  }
  func.func @transform_3(%arg0: i32) -> (i32, i32, i32) {
    %c0_i32 = arith.constant 0 : i32
    %c0_i32_0 = arith.constant 0 : i32
    %c0_i32_1 = arith.constant 0 : i32
    return %arg0, %c0_i32, %c0_i32_0 : i32, i32, i32
  }
}

</mosaic_0001>

<bundles_post_ra>
// kernel: deepsvdd_forward.1
= control target key start
LH: loop header
LB: loop body
LE: loop exit
PB: predicated region body
PF: predicated region fallthrough
CT: control target
= control target key end

     0   :  { %v812_v47 = vmov 1983009808   ;;  %v151_v49 = vlaneseq  ;;  %s1256_s0 = inlined_call_operand.vmem [shape: f32[2,1024], index: 0, kind: input, shape index: {}]   ;;  %s1257_s1 = inlined_call_operand.vmem [shape: f32[1024,128], index: 1, kind: input, shape index: {}]   ;;  %s1258_s2 = inlined_call_operand.vmem [shape: f32[1,128], index: 2, kind: input, shape index: {}]   ;;  %s1259_s3 = inlined_call_operand.hbm [shape: f32[1,1,2], index: 3, kind: output, shape index: {}]  }
   0x1   :  { %v33_v0 = vld [vmem:[%s1257_s1 + $0x80] sm:$0xff]  ;;  %v34_v1 = vld [vmem:[%s1257_s1 + $0x88] sm:$0xff]  ;;  %v35_v11 = vld [vmem:[%s1257_s1 + $0x90] sm:$0xff]  ;;  %v149_v48 = vunpack.c.l.s4 %v812_v47 }
   0x2   :  { %v65_v2 = vld [vmem:[%s1257_s1 + $0x180] sm:$0xff]  ;;  %v654_v3 = vpack.c.bf16 %v34_v1, %v33_v0  ;;  %v66_v4 = vld [vmem:[%s1257_s1 + $0x188] sm:$0xff]  ;;  %v36_v13 = vld [vmem:[%s1257_s1 + $0x98] sm:$0xff]  ;;  %v961_v0 = vshrl.u32 %v151_v49, 7 }
   0x3   :  { %v17_v5 = vld [vmem:[%s1257_s1] sm:$0xff]  ;;  %v18_v6 = vld [vmem:[%s1257_s1 + $0x8] sm:$0xff]  ;;  %v686_v7 = vpack.c.bf16 %v66_v4, %v65_v2  ;;  %v67_v14 = vld [vmem:[%s1257_s1 + $0x190] sm:$0xff]  ;;  %v658_v16 = vpack.c.bf16 %v36_v13, %v35_v11  ;;  %v150_v63 = vunpack.c.0.s8 %v149_v48 }
   0x4   :  { %v656_v8 = vpack.c.bf16 %v18_v6, %v17_v5  ;;  %v49_v9 = vld [vmem:[%s1257_s1 + $0x100] sm:$0xff]  ;;  %v50_v10 = vld [vmem:[%s1257_s1 + $0x108] sm:$0xff]  ;;  %655 = vmatprep.subr.bf16.mxu0 %v654_v3  ;;  %v68_v15 = vld [vmem:[%s1257_s1 + $0x198] sm:$0xff] }
   0x5   :  { %v688_v12 = vpack.c.bf16 %v50_v10, %v49_v9  ;;  %687 = vmatprep.subr.bf16.mxu1 %v686_v7  ;;  %v690_v17 = vpack.c.bf16 %v68_v15, %v67_v14  ;;  %v19_v18 = vld [vmem:[%s1257_s1 + $0x10] sm:$0xff]  ;;  %v20_v19 = vld [vmem:[%s1257_s1 + $0x18] sm:$0xff]  ;;  %v37_v23 = vld [vmem:[%s1257_s1 + $0xa0] sm:$0xff]  ;;  %v988_v13 = vsub.s32 %v150_v63, %v961_v0 }
   0x6   :  { %657 = vmatpush3.bf16.msra.mxu0 %v656_v8  ;;  %v51_v20 = vld [vmem:[%s1257_s1 + $0x110] sm:$0xff]  ;;  %v660_v21 = vpack.c.bf16 %v20_v19, %v19_v18  ;;  %v52_v22 = vld [vmem:[%s1257_s1 + $0x118] sm:$0xff]  ;;  %v38_v24 = vld [vmem:[%s1257_s1 + $0xa8] sm:$0xff] }
   0x7   :  { %689 = vmatpush3.bf16.msra.mxu1 %v688_v12  ;;  %659 = vmatprep.subr.bf16.mxu0 %v658_v16  ;;  %v692_v25 = vpack.c.bf16 %v52_v22, %v51_v20  ;;  %v662_v26 = vpack.c.bf16 %v38_v24, %v37_v23  ;;  %v69_v27 = vld [vmem:[%s1257_s1 + $0x1a0] sm:$0xff]  ;;  %v70_v28 = vld [vmem:[%s1257_s1 + $0x1a8] sm:$0xff]  ;;  %v39_v35 = vld [vmem:[%s1257_s1 + $0xb0] sm:$0xff] }
   0x8   :  { %691 = vmatprep.subr.bf16.mxu1 %v690_v17  ;;  %v21_v29 = vld [vmem:[%s1257_s1 + $0x20] sm:$0xff]  ;;  %v694_v30 = vpack.c.bf16 %v70_v28, %v69_v27  ;;  %v22_v31 = vld [vmem:[%s1257_s1 + $0x28] sm:$0xff]  ;;  %v40_v36 = vld [vmem:[%s1257_s1 + $0xb8] sm:$0xff] }
   0x9   :  { %v53_v32 = vld [vmem:[%s1257_s1 + $0x120] sm:$0xff]  ;;  %v54_v33 = vld [vmem:[%s1257_s1 + $0x128] sm:$0xff]  ;;  %v664_v34 = vpack.c.bf16 %v22_v31, %v21_v29  ;;  %v71_v37 = vld [vmem:[%s1257_s1 + $0x1b0] sm:$0xff]  ;;  %v666_v39 = vpack.c.bf16 %v40_v36, %v39_v35 }
   0xa   :  { %661 = vmatpush3.bf16.msra.mxu0 %v660_v21  ;;  %v696_v38 = vpack.c.bf16 %v54_v33, %v53_v32  ;;  %v72_v40 = vld [vmem:[%s1257_s1 + $0x1b8] sm:$0xff]  ;;  %v23_v41 = vld [vmem:[%s1257_s1 + $0x30] sm:$0xff]  ;;  %v41_v46 = vld [vmem:[%s1257_s1 + $0xc0] sm:$0xff] }
   0xb   :  { %693 = vmatpush3.bf16.msra.mxu1 %v692_v25  ;;  %663 = vmatprep.subr.bf16.mxu0 %v662_v26  ;;  %v24_v42 = vld [vmem:[%s1257_s1 + $0x38] sm:$0xff]  ;;  %v698_v43 = vpack.c.bf16 %v72_v40, %v71_v37  ;;  %v55_v44 = vld [vmem:[%s1257_s1 + $0x130] sm:$0xff]  ;;  %v42_v50 = vld [vmem:[%s1257_s1 + $0xc8] sm:$0xff] }
   0xc   :  { %695 = vmatprep.subr.bf16.mxu1 %v694_v30  ;;  %v56_v45 = vld [vmem:[%s1257_s1 + $0x138] sm:$0xff]  ;;  %v73_v51 = vld [vmem:[%s1257_s1 + $0x1c0] sm:$0xff]  ;;  %v74_v52 = vld [vmem:[%s1257_s1 + $0x1c8] sm:$0xff]  ;;  %v668_v53 = vpack.c.bf16 %v24_v42, %v23_v41  ;;  %v670_v55 = vpack.c.bf16 %v42_v50, %v41_v46 }
   0xd   :  { %v700_v54 = vpack.c.bf16 %v56_v45, %v55_v44  ;;  %v25_v56 = vld [vmem:[%s1257_s1 + $0x40] sm:$0xff]  ;;  %v26_v57 = vld [vmem:[%s1257_s1 + $0x48] sm:$0xff]  ;;  %v702_v59 = vpack.c.bf16 %v74_v52, %v73_v51  ;;  %v43_v61 = vld [vmem:[%s1257_s1 + $0xd0] sm:$0xff] }
   0xe   :  { %665 = vmatpush3.bf16.msra.mxu0 %v664_v34  ;;  %v57_v58 = vld [vmem:[%s1257_s1 + $0x140] sm:$0xff]  ;;  %v58_v60 = vld [vmem:[%s1257_s1 + $0x148] sm:$0xff]  ;;  %v44_v62 = vld [vmem:[%s1257_s1 + $0xd8] sm:$0xff]  ;;  %v672_v3 = vpack.c.bf16 %v26_v57, %v25_v56 }
   0xf   :  { %697 = vmatpush3.bf16.msra.mxu1 %v696_v38  ;;  %667 = vmatprep.subr.bf16.mxu0 %v666_v39  ;;  %v75_v1 = vld [vmem:[%s1257_s1 + $0x1d0] sm:$0xff]  ;;  %v76_v2 = vld [vmem:[%s1257_s1 + $0x1d8] sm:$0xff]  ;;  %v704_v4 = vpack.c.bf16 %v58_v60, %v57_v58  ;;  %v674_v5 = vpack.c.bf16 %v44_v62, %v43_v61  ;;  %v45_v11 = vld [vmem:[%s1257_s1 + $0xe0] sm:$0xff] }
  0x10   :  { %699 = vmatprep.subr.bf16.mxu1 %v698_v43  ;;  %v27_v6 = vld [vmem:[%s1257_s1 + $0x50] sm:$0xff]  ;;  %v28_v7 = vld [vmem:[%s1257_s1 + $0x58] sm:$0xff]  ;;  %v706_v9 = vpack.c.bf16 %v76_v2, %v75_v1  ;;  %v46_v12 = vld [vmem:[%s1257_s1 + $0xe8] sm:$0xff] }
  0x11   :  { %v59_v8 = vld [vmem:[%s1257_s1 + $0x150] sm:$0xff]  ;;  %v60_v10 = vld [vmem:[%s1257_s1 + $0x158] sm:$0xff]  ;;  %v77_v14 = vld [vmem:[%s1257_s1 + $0x1e0] sm:$0xff]  ;;  %v676_v16 = vpack.c.bf16 %v28_v7, %v27_v6  ;;  %v678_v19 = vpack.c.bf16 %v46_v12, %v45_v11 }
  0x12   :  { %669 = vmatpush3.bf16.msra.mxu0 %v668_v53  ;;  %v78_v15 = vld [vmem:[%s1257_s1 + $0x1e8] sm:$0xff]  ;;  %v29_v17 = vld [vmem:[%s1257_s1 + $0x60] sm:$0xff]  ;;  %v708_v18 = vpack.c.bf16 %v60_v10, %v59_v8  ;;  %v47_v25 = vld [vmem:[%s1257_s1 + $0xf0] sm:$0xff] }
  0x13   :  { %701 = vmatpush3.bf16.msra.mxu1 %v700_v54  ;;  %671 = vmatprep.subr.bf16.mxu0 %v670_v55  ;;  %v30_v20 = vld [vmem:[%s1257_s1 + $0x68] sm:$0xff]  ;;  %v61_v21 = vld [vmem:[%s1257_s1 + $0x160] sm:$0xff]  ;;  %v710_v23 = vpack.c.bf16 %v78_v15, %v77_v14  ;;  %v48_v26 = vld [vmem:[%s1257_s1 + $0xf8] sm:$0xff] }
  0x14   :  { %703 = vmatprep.subr.bf16.mxu1 %v702_v59  ;;  %v15_v22 = vld [vmem:[%s1256_s0] sm:$0xff]  ;;  %v62_v24 = vld [vmem:[%s1257_s1 + $0x168] sm:$0xff]  ;;  %v79_v29 = vld [vmem:[%s1257_s1 + $0x1f0] sm:$0xff]  ;;  %v680_v31 = vpack.c.bf16 %v30_v20, %v29_v17  ;;  %v682_v35 = vpack.c.bf16 %v48_v26, %v47_v25 }
  0x15   :  { %v154_v27 = vrot.slane %v15_v22, %v988_v13  ;;  %v147_v28 = vcombine.high %v15_v22, %v15_v22  ;;  %v80_v30 = vld [vmem:[%s1257_s1 + $0x1f8] sm:$0xff]  ;;  %v712_v34 = vpack.c.bf16 %v62_v24, %v61_v21  ;;  %v31_v36 = vld [vmem:[%s1257_s1 + $0x70] sm:$0xff]  ;;  %v97_v42 = vld [vmem:[%s1257_s1 + $0x280] sm:$0xff] }
  0x16   :  { %673 = vmatpush3.bf16.msra.mxu0 %v672_v3  ;;  %v32_v37 = vld [vmem:[%s1257_s1 + $0x78] sm:$0xff]  ;;  %v63_v38 = vld [vmem:[%s1257_s1 + $0x170] sm:$0xff]  ;;  %v714_v39 = vpack.c.bf16 %v80_v30, %v79_v29  ;;  %v98_v43 = vld [vmem:[%s1257_s1 + $0x288] sm:$0xff] }
  0x17   :  { %705 = vmatpush3.bf16.msra.mxu1 %v704_v4  ;;  %675 = vmatprep.subr.bf16.mxu0 %v674_v5  ;;  %v162_v32 = vcombine.high %v154_v27, %v154_v27  ;;  %v161_v33 = vrot.slane %v147_v28, %v988_v13  ;;  %v64_v40 = vld [vmem:[%s1257_s1 + $0x178] sm:$0xff]  ;;  %v129_v44 = vld [vmem:[%s1257_s1 + $0x380] sm:$0xff]  ;;  %v130_v45 = vld [vmem:[%s1257_s1 + $0x388] sm:$0xff]  ;;  %v684_v46 = vpack.c.bf16 %v32_v37, %v31_v36 }
  0x18   :  { %707 = vmatprep.subr.bf16.mxu1 %v706_v9  ;;  %v716_v47 = vpack.c.bf16 %v64_v40, %v63_v38  ;;  %v718_v48 = vpack.c.bf16 %v98_v43, %v97_v42  ;;  %v81_v50 = vld [vmem:[%s1257_s1 + $0x200] sm:$0xff]  ;;  %v82_v51 = vld [vmem:[%s1257_s1 + $0x208] sm:$0xff]  ;;  %v750_v53 = vpack.c.bf16 %v130_v45, %v129_v44  ;;  %v99_v55 = vld [vmem:[%s1257_s1 + $0x290] sm:$0xff] }
  0x19   :  { %253 = vmatprep.mubr.f32.mxu0 %v162_v32  ;;  %v163_v41 = vcombine.high %v161_v33, %v161_v33  ;;  %v113_v52 = vld [vmem:[%s1257_s1 + $0x300] sm:$0xff]  ;;  %v114_v54 = vld [vmem:[%s1257_s1 + $0x308] sm:$0xff]  ;;  %v100_v56 = vld [vmem:[%s1257_s1 + $0x298] sm:$0xff]  ;;  %v720_v59 = vpack.c.bf16 %v82_v51, %v81_v50 }
  0x1a   :  { %677 = vmatpush3.bf16.msra.mxu0 %v676_v16  ;;  %v131_v57 = vld [vmem:[%s1257_s1 + $0x390] sm:$0xff]  ;;  %v132_v58 = vld [vmem:[%s1257_s1 + $0x398] sm:$0xff]  ;;  %v752_v60 = vpack.c.bf16 %v114_v54, %v113_v52  ;;  %v722_v61 = vpack.c.bf16 %v100_v56, %v99_v55  ;;  %v101_v4 = vld [vmem:[%s1257_s1 + $0x2a0] sm:$0xff] }
  0x1b   :  { %709 = vmatpush3.bf16.msra.mxu1 %v708_v18  ;;  %679 = vmatprep.subr.bf16.mxu0 %v678_v19  ;;  %v83_v62 = vld [vmem:[%s1257_s1 + $0x210] sm:$0xff]  ;;  %v84_v63 = vld [vmem:[%s1257_s1 + $0x218] sm:$0xff]  ;;  %v754_v2 = vpack.c.bf16 %v132_v58, %v131_v57  ;;  %v102_v5 = vld [vmem:[%s1257_s1 + $0x2a8] sm:$0xff] }
  0x1c   :  { %711 = vmatprep.subr.bf16.mxu1 %v710_v23  ;;  %323 = vmatprep.mubr.f32.mxu1 %v163_v41  ;;  %v115_v1 = vld [vmem:[%s1257_s1 + $0x310] sm:$0xff]  ;;  %v116_v3 = vld [vmem:[%s1257_s1 + $0x318] sm:$0xff]  ;;  %v133_v6 = vld [vmem:[%s1257_s1 + $0x3a0] sm:$0xff]  ;;  %v724_v8 = vpack.c.bf16 %v84_v63, %v83_v62  ;;  %v726_v10 = vpack.c.bf16 %v102_v5, %v101_v4 }
  0x1d   :  { %v134_v7 = vld [vmem:[%s1257_s1 + $0x3a8] sm:$0xff]  ;;  %v756_v9 = vpack.c.bf16 %v116_v3, %v115_v1  ;;  %v85_v11 = vld [vmem:[%s1257_s1 + $0x220] sm:$0xff]  ;;  %v103_v17 = vld [vmem:[%s1257_s1 + $0x2b0] sm:$0xff] }
  0x1e   :  { %681 = vmatpush3.bf16.msra.mxu0 %v680_v31  ;;  %v86_v12 = vld [vmem:[%s1257_s1 + $0x228] sm:$0xff]  ;;  %v117_v14 = vld [vmem:[%s1257_s1 + $0x320] sm:$0xff]  ;;  %v758_v15 = vpack.c.bf16 %v134_v7, %v133_v6  ;;  %v104_v18 = vld [vmem:[%s1257_s1 + $0x2b8] sm:$0xff] }
  0x1f   :  { %713 = vmatpush3.bf16.msra.mxu1 %v712_v34  ;;  %683 = vmatprep.subr.bf16.mxu0 %v682_v35  ;;  %v118_v16 = vld [vmem:[%s1257_s1 + $0x328] sm:$0xff]  ;;  %v135_v19 = vld [vmem:[%s1257_s1 + $0x3b0] sm:$0xff]  ;;  %v136_v20 = vld [vmem:[%s1257_s1 + $0x3b8] sm:$0xff]  ;;  %v728_v21 = vpack.c.bf16 %v86_v12, %v85_v11  ;;  %v730_v24 = vpack.c.bf16 %v104_v18, %v103_v17 }
  0x20   :  { %715 = vmatprep.subr.bf16.mxu1 %v714_v39  ;;  %v87_v22 = vld [vmem:[%s1257_s1 + $0x230] sm:$0xff]  ;;  %v760_v23 = vpack.c.bf16 %v118_v16, %v117_v14  ;;  %v88_v25 = vld [vmem:[%s1257_s1 + $0x238] sm:$0xff]  ;;  %v762_v28 = vpack.c.bf16 %v136_v20, %v135_v19  ;;  %v105_v29 = vld [vmem:[%s1257_s1 + $0x2c0] sm:$0xff] }
  0x21   :  { %v119_v26 = vld [vmem:[%s1257_s1 + $0x330] sm:$0xff]  ;;  %v106_v30 = vld [vmem:[%s1257_s1 + $0x2c8] sm:$0xff]  ;;  %v137_v31 = vld [vmem:[%s1257_s1 + $0x3c0] sm:$0xff] }
  0x22   :  { %685 = vmatpush3.bf16.msra.mxu0 %v684_v46  ;;  %v138_v32 = vld [vmem:[%s1257_s1 + $0x3c8] sm:$0xff] }
  0x23   :  { %717 = vmatpush3.bf16.msra.mxu1 %v716_v47  ;;  %719 = vmatprep.subr.bf16.mxu0 %v718_v48 }
  0x24   :  { %751 = vmatprep.subr.bf16.mxu1 %v750_v53 }
  0x25   :  { %254 = vmatmul.mubr.f32.vlgmr.msra.gmra.mrb[0].mxu0 %v154_v27  ;;  %v120_v27 = vld [vmem:[%s1257_s1 + $0x338] sm:$0xff] }
  0x26   :  { %324 = vmatmul.mubr.f32.vlgmr.msra.gmra.mrb[0].mxu1 %v161_v33  ;;  %721 = vmatpush3.bf16.msra.mxu0 %v720_v59  ;;  %v16_v33 = vld [vmem:[%s1256_s0 + $0x8] sm:$0xff] }
  0x27   :  { %753 = vmatpush3.bf16.msra.mxu1 %v752_v60  ;;  %723 = vmatprep.subr.bf16.mxu0 %v722_v61 }
  0x28   :  { %755 = vmatprep.subr.bf16.mxu1 %v754_v2 }
  0x2a   :  { %725 = vmatpush3.bf16.msra.mxu0 %v724_v8 }
  0x2b   :  { %757 = vmatpush3.bf16.msra.mxu1 %v756_v9  ;;  %727 = vmatprep.subr.bf16.mxu0 %v726_v10 }
  0x2c   :  { %759 = vmatprep.subr.bf16.mxu1 %v758_v15 }
  0x2d   :  { %8 = vsyncpa [#allocation3], 0  ;;  %v732_v34 = vpack.c.bf16 %v88_v25, %v87_v22  ;;  %v1149_v35 = vrot.slane %v16_v33, %v988_v13  ;;  %v164_v36 = vcombine.high %v16_v33, %v16_v33  ;;  %v764_v37 = vpack.c.bf16 %v120_v27, %v119_v26  ;;  %v89_v39 = vld [vmem:[%s1257_s1 + $0x240] sm:$0xff]  ;;  %v90_v40 = vld [vmem:[%s1257_s1 + $0x248] sm:$0xff]  ;;  %s813_s28 = smov [#allocation2]  }
  0x2e   :  { %729 = vmatpush3.bf16.msra.mxu0 %v728_v21  ;;  %v734_v38 = vpack.c.bf16 %v106_v30, %v105_v29  ;;  %v121_v41 = vld [vmem:[%s1257_s1 + $0x340] sm:$0xff]  ;;  %v766_v42 = vpack.c.bf16 %v138_v32, %v137_v31  ;;  %v122_v43 = vld [vmem:[%s1257_s1 + $0x348] sm:$0xff]  ;;  %v107_v44 = vld [vmem:[%s1257_s1 + $0x2d0] sm:$0xff]  ;;  %v736_v51 = vpack.c.bf16 %v90_v40, %v89_v39  ;;  %vm478_vm0 = vcmask 1041408   ;;  %s505_s29 = sshll.u32 %s813_s28, 4  ;;  %s506_s29 = int_to_ptr.vmem [resolvable:$true] %s505_s29 }
  0x2f   :  { %761 = vmatpush3.bf16.msra.mxu1 %v760_v23  ;;  %731 = vmatprep.subr.bf16.mxu0 %v730_v24  ;;  %v108_v45 = vld [vmem:[%s1257_s1 + $0x2d8] sm:$0xff]  ;;  %v179_v46 = vcombine.high %v1149_v35, %v1149_v35  ;;  %v178_v47 = vrot.slane %v164_v36, %v988_v13  ;;  %v139_v48 = vld [vmem:[%s1257_s1 + $0x3d0] sm:$0xff]  ;;  %v768_v53 = vpack.c.bf16 %v122_v43, %v121_v41  ;;  %v109_v59 = vld [vmem:[%s1257_s1 + $0x2e0] sm:$0xff]  ;;  %v491_v43 = vand.u32 127, %v151_v49  ;;  %s792_s30 = scalar_lea.vmem %s506_s29, 32  ;;  %p793_p1 = scmp.lt.s32.totalorder %s506_s29, %s506_s29 }
  0x30   :  { %763 = vmatprep.subr.bf16.mxu1 %v762_v28  ;;  %v140_v50 = vld [vmem:[%s1257_s1 + $0x3d8] sm:$0xff]  ;;  %v738_v54 = vpack.c.bf16 %v108_v45, %v107_v44  ;;  %v91_v13 = vld [vmem:[%s1257_s1 + $0x250] sm:$0xff]  ;;  %v110_v60 = vld [vmem:[%s1257_s1 + $0x2e8] sm:$0xff]  ;;  %vm497_vm3 = vcmask 8192  }
  0x31   :  { %393 = vmatprep.mubr.f32.mxu0 %v179_v46  ;;  %v180_v52 = vcombine.high %v178_v47, %v178_v47  ;;  %v92_v55 = vld [vmem:[%s1257_s1 + $0x258] sm:$0xff]  ;;  %v123_v56 = vld [vmem:[%s1257_s1 + $0x350] sm:$0xff]  ;;  %v770_v57 = vpack.c.bf16 %v140_v50, %v139_v48  ;;  %v141_v61 = vld [vmem:[%s1257_s1 + $0x3e0] sm:$0xff]  ;;  %v742_v2 = vpack.c.bf16 %v110_v60, %v109_v59  ;;  %v494_v46 = vsub.s32 %v491_v43, %v961_v0 }
  0x32   :  { %733 = vmatpush3.bf16.msra.mxu0 %v732_v34  ;;  %v124_v58 = vld [vmem:[%s1257_s1 + $0x358] sm:$0xff]  ;;  %v142_v62 = vld [vmem:[%s1257_s1 + $0x3e8] sm:$0xff]  ;;  %v740_v63 = vpack.c.bf16 %v92_v55, %v91_v13  ;;  %v93_v3 = vld [vmem:[%s1257_s1 + $0x260] sm:$0xff] }
  0x33   :  { %765 = vmatpush3.bf16.msra.mxu1 %v764_v37  ;;  %735 = vmatprep.subr.bf16.mxu0 %v734_v38  ;;  %v772_v1 = vpack.c.bf16 %v124_v58, %v123_v56  ;;  %v94_v4 = vld [vmem:[%s1257_s1 + $0x268] sm:$0xff]  ;;  %v125_v5 = vld [vmem:[%s1257_s1 + $0x360] sm:$0xff]  ;;  %v774_v6 = vpack.c.bf16 %v142_v62, %v141_v61  ;;  %v111_v8 = vld [vmem:[%s1257_s1 + $0x2f0] sm:$0xff] }
  0x34   :  { %767 = vmatprep.subr.bf16.mxu1 %v766_v42  ;;  %463 = vmatprep.mubr.f32.mxu1 %v180_v52  ;;  %v126_v7 = vld [vmem:[%s1257_s1 + $0x368] sm:$0xff]  ;;  %v112_v9 = vld [vmem:[%s1257_s1 + $0x2f8] sm:$0xff]  ;;  %v143_v10 = vld [vmem:[%s1257_s1 + $0x3f0] sm:$0xff]  ;;  %v744_v12 = vpack.c.bf16 %v94_v4, %v93_v3 }
  0x35   :  { %v144_v11 = vld [vmem:[%s1257_s1 + $0x3f8] sm:$0xff]  ;;  %v776_v14 = vpack.c.bf16 %v126_v7, %v125_v5  ;;  %v746_v15 = vpack.c.bf16 %v112_v9, %v111_v8  ;;  %v95_v16 = vld [vmem:[%s1257_s1 + $0x270] sm:$0xff]  ;;  %v513_v38 = vld [vmem:[%s1258_s2] ss:$0 sm:$0xff]  ;;  %s788_s2 = scalar_lea.vmem %s506_s29, 16 }
  0x36   :  { %737 = vmatpush3.bf16.msra.mxu0 %v736_v51  ;;  %v96_v17 = vld [vmem:[%s1257_s1 + $0x278] sm:$0xff]  ;;  %v778_v18 = vpack.c.bf16 %v144_v11, %v143_v10  ;;  %v127_v19 = vld [vmem:[%s1257_s1 + $0x370] sm:$0xff]  ;;  %p789_p0 = scmp.ne.s32.totalorder %s506_s29, %s788_s2  ;;  %p794_p2 = scmp.lt.s32.totalorder %s792_s30, %s788_s2 }
  0x37   :  { %769 = vmatpush3.bf16.msra.mxu1 %v768_v53  ;;  %739 = vmatprep.subr.bf16.mxu0 %v738_v54  ;;  %v128_v20 = vld [vmem:[%s1257_s1 + $0x378] sm:$0xff]  ;;  %v748_v21 = vpack.c.bf16 %v96_v17, %v95_v16 }
  0x38   :  { %771 = vmatprep.subr.bf16.mxu1 %v770_v57  ;;  %v780_v22 = vpack.c.bf16 %v128_v20, %v127_v19  ;;  %p795_p3 = por %p794_p2, %p793_p1 }
  0x3a   :  { %741 = vmatpush3.bf16.msra.mxu0 %v740_v63  ;;  %p796_p4 = pnand %p795_p3, %p789_p0 }
  0x3b   :  { %773 = vmatpush3.bf16.msra.mxu1 %v772_v1  ;;  %743 = vmatprep.subr.bf16.mxu0 %v742_v2 }
  0x3c   :  { %775 = vmatprep.subr.bf16.mxu1 %v774_v6 }
  0x3e   :  { %745 = vmatpush3.bf16.msra.mxu0 %v744_v12 }
  0x3f   :  { %777 = vmatpush3.bf16.msra.mxu1 %v776_v14  ;;  %747 = vmatprep.subr.bf16.mxu0 %v746_v15 }
  0x40   :  { %779 = vmatprep.subr.bf16.mxu1 %v778_v18 }
  0x42   :  { %749 = vmatpush3.bf16.msra.mxu0 %v748_v21 }
  0x43   :  { %781 = vmatpush3.bf16.msra.mxu1 %v780_v22 }
  0x45   :  { %394 = vmatmul.mubr.f32.vlgmr.msra.gmra.mrb[2].mxu0 %v1149_v35 }
  0x46   :  { %464 = vmatmul.mubr.f32.vlgmr.msra.gmra.mrb[2].mxu1 %v178_v47 }
  0xf8   :  { %v546_v23 = vpop.f32.mrb[0].mxu0 }
  0xf9   :  { %v581_v24 = vpop.f32.mrb[0].mxu1  ;;  %v547_v25 = vpop.f32.mrb[1].mxu0 }
  0xfa   :  { %v548_v26 = vadd.f32 %v547_v25, %v546_v23  ;;  %v582_v27 = vpop.f32.mrb[1].mxu1 }
  0xfb   :  { %v583_v28 = vadd.f32 %v582_v27, %v581_v24 }
  0xfd   :  { %v326_v29 = vadd.f32 %v583_v28, %v548_v26 }
 0x118   :  { %v616_v30 = vpop.f32.mrb[2].mxu0 }
 0x119   :  { %v617_v31 = vpop.f32.mrb[3].mxu0  ;;  %v651_v32 = vpop.f32.mrb[2].mxu1 }
 0x11a   :  { %v618_v33 = vadd.f32 %v617_v31, %v616_v30  ;;  %v652_v34 = vpop.f32.mrb[3].mxu1 }
 0x11b   :  { %v653_v36 = vadd.f32 %v652_v34, %v651_v32 }
 0x11c   :  { %v396_v37 = vadd.f32 %v618_v33, %v326_v29 }
 0x11e   :  { %v466_v35 = vadd.f32 %v653_v36, %v396_v37 }
 0x120   :  { %v476_v39 = vsub.f32 %v466_v35, %v513_v38 }
 0x122   :  { %v477_v40 = vmul.f32 %v476_v39, %v476_v39 }
 0x124   :  { %v479_v41 = vsel %vm478_vm0, %v477_v40, 0.0 }
 0x125   :  { %480 = vadd.xlane.f32.xlu0 %v479_v41 }
 0x1b2   :  { %v481_v42 = vpop.xlane.xlu0 %480 }
 0x1b3   :  { %786 = vrsqrt.f32 %v481_v42  ;;  %vm484_vm1 = vcmp.eq.f32.partialorder %v481_v42, inf  ;;  %v487_v47 = vand.u32 2147483648, %v481_v42  ;;  %vm486_vm2 = vcmp.eq.f32.partialorder %v481_v42, 0.0 }
 0x1bd   :  { %v787_v44 = vpop.eup %786 }
 0x1be   :  { %v483_v45 = vmul.f32 %v787_v44, %v481_v42 }
 0x1c0   :  { %v485_v48 = vsel %vm484_vm1, %v481_v42, %v483_v45 }
 0x1c1   :  { %v488_v50 = vsel %vm486_vm2, %v487_v47, %v485_v48 }
 0x1c2   :  { %v495_v51 = vrot.slane %v488_v50, %v494_v46 }
 0x1c4   :  { %498 = vst.msk [vmem:[#allocation2] sm:$0x1] %vm497_vm3, %v495_v51 }
 0x1c5   :  { %799 = shalt.err (!%p796_p4)
}
 0x1c6   :  { %s800_s5 = scalar_lea.hbm %s1259_s3, 16 }
 0x1c7   :  { %p801_p5 = scmp.ne.s32.totalorder %s1259_s3, %s800_s5  ;;  %p804_p6 = scmp.lt.u32.totalorder %s800_s5, %s1259_s3 }
 0x1c9   :  { %p806_p7 = pnand %p804_p6, %p801_p5 }
 0x1cb   :  { %809 = shalt.err (!%p806_p7)
}
 0x1cc   :  { %508 = dma.vmem_to_hbm [thread:$0]  %s506_s29, 16, %s1259_s3, [#allocation3]  }
 0x1cd   :  { %810 = dma.done.wait [#allocation3], 16  }
 0x1ce   :  { %811 = vsyncadd [#allocation3], 4294967280 }
 0x1cf   :  { %512 = vsyncpa [#allocation3], 1 }

</bundles_post_ra>
